<compile_context>
chip_gen: v6e
topology: v6e:2x2x1
jax: 0.10.0
libtpu: 0.0.40
codegen_flags: <defaults>
</compile_context>

<pallas_src>
import math
from functools import partial

import jax
import jax.numpy as jnp
from jax.experimental import pallas as pl
from jax.experimental.pallas import tpu as pltpu


def _round_up(x, m):
    return ((x + m - 1) // m) * m


def _mlp_layer_kernel(x_ref, w_ref, b_ref, o_ref, h_ref):
    """One (batch_tile, layer) grid step: h <- relu(h @ W_l + b_l)."""
    layer = pl.program_id(1)

    @pl.when(layer == 0)
    def _():
        h_ref[...] = x_ref[...]  # load this batch tile's activations into the carried scratch

    # bf16 MXU operands, f32 accumulation.
    y = jnp.dot(h_ref[...].astype(w_ref.dtype), w_ref[0],
                preferred_element_type=jnp.float32)
    h = jnp.maximum(y + b_ref[0], 0.0)  # f32 bias + ReLU epilogue (free VALU slots under MXU)
    h_ref[...] = h

    @pl.when(layer == pl.num_programs(1) - 1)
    def _():
        o_ref[...] = h.astype(o_ref.dtype)  # single lane-dense store per batch tile


def pad_and_stack_params(params, input_size, weight_dtype=jnp.bfloat16):
    """ONE-TIME padding/stacking of parameters (hoisted out of the per-call forward).

    params: list of (w, b) with w shaped (in, out) (already transposed for x @ W).
    Returns (w_stack (L, D, D) weight_dtype, b_stack (L, 1, D) f32), zero-padded to a
    shared lane-dense width D = round_up(max(dims), 128).
    """
    dims = [input_size] + [w.shape[1] for w, _ in params]
    D = _round_up(max(dims), 128)
    L = len(params)
    w_stack = jnp.zeros((L, D, D), weight_dtype)
    b_stack = jnp.zeros((L, 1, D), jnp.float32)
    for l, (w, b) in enumerate(params):
        w_stack = w_stack.at[l, : w.shape[0], : w.shape[1]].set(w.astype(weight_dtype))
        b_stack = b_stack.at[l, :, : b.shape[1]].set(b.astype(jnp.float32))
    return w_stack, b_stack


@partial(jax.jit, static_argnames=("out_features",))
def mlp_forward(x, w_stack, b_stack, *, out_features=1):
    """Fused forward: (Linear -> ReLU -> [Dropout=id]) * N, final Linear(->1) -> ReLU.

    x: (B, In) f32. w_stack: (L, D, D) pre-padded weights. b_stack: (L, 1, D) pre-padded biases.
    Returns (B, out_features) f32.
    """
    B, In = x.shape
    L, D, _ = w_stack.shape

    # Batch tiling: TM multiple of 8 (sublane), capped at 2048; if the batch allows, pick TM so
    # the "parallel" batch axis has >= 2 grid steps (shards across v7x's two TensorCores).
    TM_CAP = 2048
    B_pad = _round_up(B, 8)
    if B_pad > TM_CAP:
        TM = TM_CAP
    elif B_pad >= 16:
        TM = _round_up(pl.cdiv(B_pad, 2), 8)
    else:
        TM = B_pad
    B_pad = _round_up(B_pad, TM)

    # Zero-pad activations to (B_pad, D); padded lanes stay exactly zero through Linear+ReLU,
    # padded batch rows are sliced off below.
    x_pad = jnp.zeros((B_pad, D), jnp.float32).at[:B, :In].set(x.astype(jnp.float32))

    # Explicit VMEM budget: double-buffered in + out tiles, f32 activation scratch, one layer's
    # weights/bias double-buffered.  Set the limit with headroom instead of the scoped default.
    est = (2 * TM * D * 4) + (2 * TM * D * 4) + (TM * D * 4) \
        + 2 * D * D * w_stack.dtype.itemsize + 2 * D * 4
    vmem_limit = int(min(max(2 * est, 16 << 20), 48 << 20))

    out_pad = pl.pallas_call(
        _mlp_layer_kernel,
        out_shape=jax.ShapeDtypeStruct((B_pad, D), jnp.float32),
        grid_spec=pltpu.PrefetchScalarGridSpec(
            num_scalar_prefetch=0,
            grid=(B_pad // TM, L),
            in_specs=[
                pl.BlockSpec((TM, D), lambda i, l: (i, 0)),       # activations (const over l)
                pl.BlockSpec((1, D, D), lambda i, l: (l, 0, 0)),  # stream one layer's weights
                pl.BlockSpec((1, 1, D), lambda i, l: (l, 0, 0)),  # stream one layer's bias
            ],
            out_specs=pl.BlockSpec((TM, D), lambda i, l: (i, 0)),  # resident over l, lane-dense
            scratch_shapes=[pltpu.VMEM((TM, D), jnp.float32)],     # h carried across layers
        ),
        compiler_params=pltpu.CompilerParams(
            dimension_semantics=("parallel", "arbitrary"),
            vmem_limit_bytes=vmem_limit,
        ),
    )(x_pad, w_stack, b_stack)

    # Slice away batch / lane padding; valid result lives in the first `out_features` lanes.
    return out_pad[:B, :out_features]


def init_mlp_params(key, input_size, layer_sizes):
    """Deterministic PyTorch-style init: U(-1/sqrt(fan_in), 1/sqrt(fan_in)).

    Returns a list of (w, b) with w shaped (in, out) (already transposed for x @ W).
    """
    dims = [input_size] + list(layer_sizes) + [1]
    params = []
    for i in range(len(dims) - 1):
        fan_in, fan_out = dims[i], dims[i + 1]
        key, kw, kb = jax.random.split(key, 3)
        bound = 1.0 / math.sqrt(fan_in)
        w = jax.random.uniform(kw, (fan_in, fan_out), jnp.float32, -bound, bound)
        b = jax.random.uniform(kb, (1, fan_out), jnp.float32, -bound, bound)
        params.append((w, b))
    return params


if __name__ == "__main__":
    key = jax.random.PRNGKey(0)
    key, kx = jax.random.split(key)

    batch = 8
    input_size = 16
    layer_sizes = [32, 32]

    x = jax.random.normal(kx, (batch, input_size), jnp.float32)
    params = init_mlp_params(key, input_size, layer_sizes)

    # One-time parameter prep (hoisted out of the jitted forward per perf review).
    w_stack, b_stack = pad_and_stack_params(params, input_size)

    out = mlp_forward(x, w_stack, b_stack, out_features=1)
    out = jax.block_until_ready(out)

    # Pure-JAX reference with matched numerics (bf16 matmul operands, f32 accumulation).
    # Same semantics as the module: ReLU after every Linear incl. the last; Dropout is identity.
    ref = x
    for w, b in params:
        a = ref.astype(jnp.bfloat16).astype(jnp.float32)
        wq = w.astype(jnp.bfloat16).astype(jnp.float32)
        ref = jnp.maximum(jnp.dot(a, wq, precision=jax.lax.Precision.HIGHEST) + b, 0.0)

    assert out.shape == (batch, 1), out.shape
    assert jnp.allclose(out, ref, atol=1e-2, rtol=1e-2), float(jnp.max(jnp.abs(out - ref)))

    print("KERNEL_OK")
</pallas_src>

<mosaic_0001>
module attributes {stable_mosaic.version = 11 : i64} {
  func.func @_mlp_layer_kernel(%arg0: i32, %arg1: i32, %arg2: memref<8x128xf32, #tpu.memory_space<vmem>>, %arg3: memref<1x128x128xbf16, #tpu.memory_space<vmem>>, %arg4: memref<1x1x128xf32, #tpu.memory_space<vmem>>, %arg5: memref<8x128xf32, #tpu.memory_space<vmem>>, %arg6: memref<8x128xf32, #tpu.memory_space<vmem>>) attributes {dimension_semantics = [#tpu.dimension_semantics<parallel>, #tpu.dimension_semantics<arbitrary>], iteration_bounds = array<i64: 1, 3>, scalar_prefetch = 0 : i64, scratch_operands = 1 : i64, tpu.core_type = #tpu.core_type<tc>, window_params = [{transform_indices = @transform_0, window_bounds = array<i64: 8, 128>}, {transform_indices = @transform_1, window_bounds = array<i64: 1, 128, 128>}, {transform_indices = @transform_2, window_bounds = array<i64: 1, 1, 128>}, {transform_indices = @transform_3, window_bounds = array<i64: 8, 128>}]} {
    %c0_i32 = arith.constant 0 : i32
    %0 = arith.cmpi eq, %arg1, %c0_i32 : i32
    %1 = arith.extui %0 : i1 to i32
    %c0_i32_0 = arith.constant 0 : i32
    %2 = arith.cmpi ne, %1, %c0_i32_0 : i32
    scf.if %2 {
      %c0_12 = arith.constant 0 : index
      %c0_13 = arith.constant 0 : index
      %18 = vector.load %arg2[%c0_12, %c0_13] : memref<8x128xf32, #tpu.memory_space<vmem>>, vector<8x128xf32>
      %c0_14 = arith.constant 0 : index
      %c0_15 = arith.constant 0 : index
      %19 = vector.load %arg6[%c0_14, %c0_15] : memref<8x128xf32, #tpu.memory_space<vmem>>, vector<8x128xf32>
      tpu.vector_store %arg6[%c0_14, %c0_15], %18 {strides = array<i32>} : memref<8x128xf32, #tpu.memory_space<vmem>>, vector<8x128xf32>,
    } else {
    }
    %c0 = arith.constant 0 : index
    %c0_1 = arith.constant 0 : index
    %3 = vector.load %arg6[%c0, %c0_1] : memref<8x128xf32, #tpu.memory_space<vmem>>, vector<8x128xf32>
    %4 = arith.truncf %3 : vector<8x128xf32> to vector<8x128xbf16>
    %c0_2 = arith.constant 0 : index
    %c0_3 = arith.constant 0 : index
    %c0_4 = arith.constant 0 : index
    %5 = vector.load %arg3[%c0_2, %c0_3, %c0_4] : memref<1x128x128xbf16, #tpu.memory_space<vmem>>, vector<1x128x128xbf16>
    %6 = vector.shape_cast %5 : vector<1x128x128xbf16> to vector<128x128xbf16>
    %cst = arith.constant dense<0.000000e+00> : vector<8x128xf32>
    %7 = tpu.matmul %4, %6, %cst {dimension_numbers = #tpu.dot_dimension_numbers<[1], [0], [0], [1], [0, 0, 1, 1], [], []>} : vector<8x128xbf16>, vector<128x128xbf16>, vector<8x128xf32> -> vector<8x128xf32>
    %c0_5 = arith.constant 0 : index
    %c0_6 = arith.constant 0 : index
    %c0_7 = arith.constant 0 : index
    %8 = vector.load %arg4[%c0_5, %c0_6, %c0_7] : memref<1x1x128xf32, #tpu.memory_space<vmem>>, vector<1x1x128xf32>
    %9 = vector.shape_cast %8 : vector<1x1x128xf32> to vector<1x128xf32>
    %10 = vector.broadcast %9 : vector<1x128xf32> to vector<8x128xf32>
    %11 = arith.addf %7, %10 : vector<8x128xf32>
    %cst_8 = arith.constant 0.000000e+00 : f32
    %12 = vector.broadcast %cst_8 : f32 to vector<8x128xf32>
    %13 = arith.maximumf %11, %12 : vector<8x128xf32>
    %c0_9 = arith.constant 0 : index
    %c0_10 = arith.constant 0 : index
    %14 = vector.load %arg6[%c0_9, %c0_10] : memref<8x128xf32, #tpu.memory_space<vmem>>, vector<8x128xf32>
    tpu.vector_store %arg6[%c0_9, %c0_10], %13 {strides = array<i32>} : memref<8x128xf32, #tpu.memory_space<vmem>>, vector<8x128xf32>,
    %c2_i32 = arith.constant 2 : i32
    %15 = arith.cmpi eq, %arg1, %c2_i32 : i32
    %16 = arith.extui %15 : i1 to i32
    %c0_i32_11 = arith.constant 0 : i32
    %17 = arith.cmpi ne, %16, %c0_i32_11 : i32
    scf.if %17 {
      %c0_12 = arith.constant 0 : index
      %c0_13 = arith.constant 0 : index
      %18 = vector.load %arg5[%c0_12, %c0_13] : memref<8x128xf32, #tpu.memory_space<vmem>>, vector<8x128xf32>
      tpu.vector_store %arg5[%c0_12, %c0_13], %13 {strides = array<i32>} : memref<8x128xf32, #tpu.memory_space<vmem>>, vector<8x128xf32>,
    } else {
    }
    return
  }
  func.func @transform_0(%arg0: i32, %arg1: i32) -> (i32, i32) {
    %c0_i32 = arith.constant 0 : i32
    %c0_i32_0 = arith.constant 0 : i32
    return %arg0, %c0_i32 : i32, i32
  }
  func.func @transform_1(%arg0: i32, %arg1: i32) -> (i32, i32, i32) {
    %c0_i32 = arith.constant 0 : i32
    %c0_i32_0 = arith.constant 0 : i32
    %c0_i32_1 = arith.constant 0 : i32
    return %arg1, %c0_i32, %c0_i32_0 : i32, i32, i32
  }
  func.func @transform_2(%arg0: i32, %arg1: i32) -> (i32, i32, i32) {
    %c0_i32 = arith.constant 0 : i32
    %c0_i32_0 = arith.constant 0 : i32
    %c0_i32_1 = arith.constant 0 : i32
    return %arg1, %c0_i32, %c0_i32_0 : i32, i32, i32
  }
  func.func @transform_3(%arg0: i32, %arg1: i32) -> (i32, i32) {
    %c0_i32 = arith.constant 0 : i32
    %c0_i32_0 = arith.constant 0 : i32
    return %arg0, %c0_i32 : i32, i32
  }
}

</mosaic_0001>

<bundles_post_ra>
// kernel: mlp_forward.1
= control target key start
LH: loop header
LB: loop body
LE: loop exit
PB: predicated region body
PF: predicated region fallthrough
CT: control target
= control target key end

     0   :  { %8 = vsyncpa [#allocation4], 0  ;;  %s800_s0 = inlined_call_operand.vmem [shape: f32[8,128], index: 0, kind: input, shape index: {}]   ;;  %s801_s1 = inlined_call_operand.hbm [shape: bf16[3,128,128], index: 1, kind: input, shape index: {}]   ;;  %s802_s2 = inlined_call_operand.vmem [shape: f32[3,1,128], index: 2, kind: input, shape index: {}]   ;;  %s803_s3 = inlined_call_operand.vmem [shape: f32[8,128], index: 3, kind: output, shape index: {}]  }
   0x1   :  { %10 = vsyncpa [#allocation4 + $0x1], 0  ;;  %s678_s12 = smov 0   ;;  %s680_s13 = smov 0  }
   0x2   :  { %s682_s14 = smov 0   ;;  %s684_s15 = smov 0  }
   0x3   :  { %s686_s16 = smov 0   ;;  %s688_s17 = smov 0  }
   0x4 LB: > { %s453_s18 = sadd.s32 4294967295, %s651_s17   ;;  %s25_s19 = sadd.s32 1, %s647_s16  ;;  %s651_s17 = sphi %s688_s17, %s16_s17   ;;  %s647_s16 = sphi %s686_s16, %s811_s16   ;;  %s643_s15 = sphi %s684_s15, %s810_s15   ;;  %s639_s14 = sphi %s682_s14, %s809_s14   ;;  %s635_s13 = sphi %s680_s13, %s808_s13   ;;  %s631_s12 = sphi %s678_s12, %s807_s12  }
   0x5   : > { %p26_p0 = scmp.ge.s32.totalorder %s25_s19, 3  ;;  %s61_s20 = sadd.s32 1, %s639_s14 }
   0x6   : > { %p68_p1 = scmp.ne.s32.totalorder %s639_s14, %s635_s13  ;;  %p69_p2 = scmp.eq.s32.totalorder %s651_s17, 0 }
   0x7   : > { %s813_s19 = smov (%p26_p0, %s25_s19), 0  ;;  %p74_p4 = scmp.ne.s32.totalorder %s635_s13, %s631_s12 }
   0x8   : > { %p714_p3 = por %p69_p2, %p68_p1  ;;  %s58_s22 = ssub.s32 %s647_s16, %s813_s19 }
   0x9   : > { %p75_p5 = scmp.eq.s32.totalorder %s453_s18, 0  ;;  %p59_p6 = scmp.eq.s32.totalorder %s58_s22, 0 }
   0xa   : > { %p512_p8 = scmp.lt.s32.totalorder %s651_s17, 3  ;;  %s157_s25 = sand.u32 1, %s639_s14  }
   0xb   : > { %p721_p7 = por %p75_p5, %p74_p4  ;;  %s476_s26 = sshll.u32 %s647_s16, 10 }
   0xc   : > { %s727_s24 = scalar_select %p59_p6, %s639_s14, %s61_s20  }
   0xd   : > { %s457_s27 = sshll.u32 %s157_s25, 6  ;;  %s167_s30 = scalar_lea.hbm %s801_s1, %s476_s26 }
   0xe   : > { %s161_s4 = scalar_lea.vmem [#allocation3], %s457_s27  ;;  %p736_p9 = pnand %p512_p8, %p714_p3 }
   0xf   : > { %s168_s5 = sshll.u32 %s161_s4, 4  ;;  %s158_s7 = scalar_lea.sflag [#allocation4], %s157_s25  ;;  %s169_s5 = int_to_ptr.vmem [resolvable:$true] %s168_s5 }
  0x10   : > { %p575_p10 = pneg %p736_p9  ;;  %s586_s8 = scalar_lea.vmem %s169_s5, 1024 }
  0x11   : > { %p587_p11 = scmp.ne.s32.totalorder %s169_s5, %s586_s8  ;;  %s653_s9 = smov [#allocation3]  }
  0x12   : > { %s591_s10 = sshll.u32 %s653_s9, 4  ;;  %s592_s10 = int_to_ptr.vmem [resolvable:$false] %s591_s10 }
  0x13   : > { %p589_p12 = pnand %p587_p11, %p575_p10  ;;  %s593_s11 = scalar_lea.vmem %s592_s10, 2048 }
  0x14   : > { %p594_p0 = scmp.lt.s32.totalorder %s169_s5, %s592_s10  ;;  %p595_p1 = scmp.lt.s32.totalorder %s593_s11, %s586_s8 }
  0x15   : > { %p590_p13 = pneg %p589_p12 }
  0x16   : > { %p596_p2 = por %p595_p1, %p594_p0 }
  0x18   : > { %p597_p3 = pnand %p596_p2, %p590_p13 }
  0x1a   : > { %600 = shalt.err (!%p597_p3)
}
  0x1b   : > { %s654_s12 = smov 64   ;;  %s655_s18 = smov 4  }
  0x1c   : > { %511 = dma.hbm_to_vmem [thread:$0]  (!%p736_p9), %s167_s30, 1024, %s169_s5, %s158_s7, %s654_s12, %s654_s12, %s655_s18  }
  0x1d   : > { %p460_p4 = scmp.ge.s32.totalorder %s651_s17, 1  ;;  %p182_p5 = scmp.lt.s32.totalorder %s651_s17, 4 }
  0x1f   : > { %p183_p6 = pnand %p460_p4, %p182_p5 }
  0x20   : > { %s188_s20 = sand.u32 (!%p183_p6), 1, %s635_s13  }
  0x21   : > { %186 = sbr.rel (%p183_p6) target bundleno = 282 (0x11a), region = 32  ;;  %s461_s21 = sshll.u32 (!%p183_p6), %s188_s20, 6 }
  0x22   : > { %s189_s22 = scalar_lea.sflag (!%p183_p6), [#allocation4], %s188_s20  ;;  %s747_s25 = scalar_lea.vmem (!%p183_p6), [#allocation3], %s461_s21 }
  0x26   : > { %626 = dma.done.wait (%p721_p7), %s189_s22, 1024  }
  0x27   : > { %628 = vsyncadd (%p721_p7), %s189_s22, 4294966272  ;;  %p225_p8 = scmp.lt.s32.totalorder %s643_s15, 2  ;;  %p462_p9 = scmp.ne.s32.totalorder %s643_s15, 0 }
  0x29   : > { %s755_s26 = scalar_select %p225_p8, %s643_s15, 2 }
  0x2a   : > { %236 = sbr.rel (%p462_p9) target bundleno = 49 (0x31), region = 40 }
  0x2b   : > { %s227_s29 = scalar_lea.vmem %s802_s2, %s755_s26 }
  0x2f   : > { %v237_v0 = vld [vmem:[%s800_s0] sm:$0xff] }
  0x30   : > { %238 = vst [vmem:[#allocation2] sm:$0xff] %v237_v0 }
  0x31 PF: > { %v565_v1 = vld [vmem:[%s747_s25 + $0x38] sm:$0xff]   ;;  %v656_v2 = vmov 0.0   ;;  %v566_v3 = vld [vmem:[%s747_s25 + $0x30] sm:$0xff]   ;;  %vm657_vm0 = vmmov 0   ;;  %v567_v4 = vld [vmem:[%s747_s25 + $0x28] sm:$0xff]   ;;  %p472_p7 = scmp.ne.s32.totalorder %s643_s15, 2 }
  0x32   : > { %486 = vmatprep.subr.bf16.mxu0 %v656_v2  ;;  %502 = vmatprep.mubr.msk.bf16.mxu0 %vm657_vm0, %v656_v2  ;;  %v568_v5 = vld [vmem:[%s747_s25 + $0x20] sm:$0xff]   ;;  %v569_v6 = vld [vmem:[%s747_s25 + $0x18] sm:$0xff]   ;;  %v570_v7 = vld [vmem:[%s747_s25 + $0x10] sm:$0xff]  }
  0x33   : > { %487 = vmatpush3.bf16.msra.mxu0 %v565_v1  ;;  %v571_v8 = vld [vmem:[%s747_s25 + $0x8] sm:$0xff]   ;;  %v572_v9 = vld [vmem:[%s747_s25] sm:$0xff]   ;;  %v463_v12 = vld [vmem:[%s227_s29] ss:$0 sm:$0xff] }
  0x34   : > { %488 = vmatprep.subr.bf16.mxu0 %v656_v2 }
  0x37   : > { %489 = vmatpush3.bf16.msra.mxu0 %v566_v3  ;;  %v239_v10 = vld [vmem:[#allocation2] sm:$0xff] }
  0x38   : > { %490 = vmatprep.subr.bf16.mxu0 %v656_v2  ;;  %v240_v11 = vpack.c.bf16 %v239_v10, %v239_v10 }
  0x3b   : > { %491 = vmatpush3.bf16.msra.mxu0 %v567_v4 }
  0x3c   : > { %492 = vmatprep.subr.bf16.mxu0 %v656_v2 }
  0x3f   : > { %493 = vmatpush3.bf16.msra.mxu0 %v568_v5 }
  0x40   : > { %494 = vmatprep.subr.bf16.mxu0 %v656_v2 }
  0x43   : > { %495 = vmatpush3.bf16.msra.mxu0 %v569_v6 }
  0x44   : > { %496 = vmatprep.subr.bf16.mxu0 %v656_v2 }
  0x47   : > { %497 = vmatpush3.bf16.msra.mxu0 %v570_v7 }
  0x48   : > { %498 = vmatprep.subr.bf16.mxu0 %v656_v2 }
  0x4b   : > { %499 = vmatpush3.bf16.msra.mxu0 %v571_v8 }
  0x4c   : > { %500 = vmatprep.subr.bf16.mxu0 %v656_v2 }
  0x4f   : > { %501 = vmatpush3.bf16.msra.mxu0 %v572_v9 }
  0x52   : > { %503 = vmatmul.mubr.bf16.vlgmr.msra.gmra.mxu0 %v240_v11 }
 0x112   : > { %v346_v13 = vpop.f32.mrf.mxu0 }
 0x113   : > { %v347_v14 = vadd.f32 %v463_v12, %v346_v13 }
 0x114   : > { %v504_v15 = vpop.f32.mrf.mxu0  ;;  %357 = sbr.rel (%p472_p7) target bundleno = 282 (0x11a), region = 44 }
 0x115   : > { %v352_v16 = vmax.f32 %v347_v14, 0.0 }
 0x116   : > { %v349_v17 = vpop.f32.mrf.mxu0 }
 0x117   : > { %353 = vst [vmem:[#allocation2] sm:$0xff] %v352_v16 }
 0x118   : > { %v505_v18 = vpop.f32.mrf.mxu0 }
 0x119   : > { %358 = vst [vmem:[%s803_s3] sm:$0xff] %v352_v16 }
 0x11a PF: > { %s16_s17 = sadd.s32 1, %s651_s17   ;;  %s807_s12 = smov %s635_s13 }
 0x11b   : > { %p13_p10 = scmp.ge.s32.totalorder %s16_s17, 5   ;;  %s808_s13 = smov %s639_s14 }
 0x11c   : > { %s809_s14 = smov %s727_s24  ;;  %s810_s15 = smov %s647_s16 }
 0x11d   : > { %s811_s16 = smov %s813_s19  ;;  %15 = sbr.rel (!%p13_p10) target bundleno = 4 (0x4), region = 86 }
 0x122   :  { %378 = vsyncpa [#allocation4], 1 }
 0x123   :  { %380 = vsyncpa [#allocation4 + $0x1], 1 }

</bundles_post_ra>
